<compile_context>
chip_gen: v7x
topology: tpu7x:2x2x1
jax: 0.10.0
libtpu: 0.0.40
codegen_flags: <defaults>
</compile_context>

<pallas_src>
import jax
import jax.numpy as jnp
from jax.experimental import pallas as pl
from jax.experimental.pallas import tpu as pltpu

_TARGET_BLOCK_BYTES = 1 * 1024 * 1024  # ~1 MiB f32 tile per image stream
_LANE = 128


def _normalize_kernel(mean_ref, std_ref, img1_ref, img2_ref, out1_ref, out2_ref):
    # mean_ref / std_ref: (R, 1) resident VMEM columns (R = N*C rows).
    # img*_ref / out*_ref: (R, COL_BLOCK) lane-dense tiles.
    m = mean_ref[...]                      # (R, 1)
    inv = 1.0 / std_ref[...]               # (R, 1): only R reciprocals per block
    out1_ref[...] = ((img1_ref[...] - m) * inv).astype(out1_ref.dtype)
    out2_ref[...] = ((img2_ref[...] - m) * inv).astype(out2_ref.dtype)


def _pick_col_block(hw, rows):
    """Largest multiple-of-128 divisor of `hw` keeping an f32 (rows, block) tile
    near _TARGET_BLOCK_BYTES.  Falls back to the full extent (always legal)."""
    max_cols = _TARGET_BLOCK_BYTES // (4 * max(rows, 1))
    if hw <= max(max_cols, _LANE):
        return hw
    max_cols = max(_LANE, (max_cols // _LANE) * _LANE)
    for cand in range(max_cols, 0, -_LANE):
        if hw % cand == 0:
            return cand
    # No multiple-of-128 divisor small enough: whole spatial extent per block.
    return hw


def normalize_images(img1, img2, mean, std):
    """Fused per-channel normalization of two NCHW images via one Pallas call."""
    assert img1.shape == img2.shape, "img1 and img2 must have the same shape"
    N, C, H, W = img1.shape
    R = N * C
    HW = H * W

    # Free reshapes (contiguous NCHW -> (N*C, H*W)): lane-dense last dim.
    x1 = img1.reshape(R, HW)
    x2 = img2.reshape(R, HW)

    # Per-row (= per (n, c)) mean / std columns, built once outside the kernel.
    mean_rows = jnp.tile(jnp.asarray(mean, jnp.float32).reshape(1, C), (N, 1)).reshape(R, 1)
    std_rows = jnp.tile(jnp.asarray(std, jnp.float32).reshape(1, C), (N, 1)).reshape(R, 1)

    col_block = _pick_col_block(HW, R)
    grid = (HW // col_block,)

    img_spec = pl.BlockSpec((R, col_block), lambda j: (0, j))
    vec_spec = pl.BlockSpec((R, 1), lambda j: (0, 0))  # constant index -> resident

    out1, out2 = pl.pallas_call(
        _normalize_kernel,
        out_shape=(
            jax.ShapeDtypeStruct((R, HW), img1.dtype),
            jax.ShapeDtypeStruct((R, HW), img2.dtype),
        ),
        grid=grid,
        in_specs=[vec_spec, vec_spec, img_spec, img_spec],
        out_specs=(img_spec, img_spec),
        compiler_params=pltpu.CompilerParams(
            dimension_semantics=("parallel",),
            vmem_limit_bytes=32 * 1024 * 1024,
        ),
    )(mean_rows, std_rows, x1, x2)

    return out1.reshape(N, C, H, W), out2.reshape(N, C, H, W)


class Normalize:
    """JAX/Pallas equivalent of the PyTorch optical-flow Normalize transform."""

    def __init__(self, mean, std):
        self.mean = jnp.asarray(mean, jnp.float32)
        self.std = jnp.asarray(std, jnp.float32)

    def __call__(self, img1, img2, flow, valid_flow_mask):
        img1, img2 = normalize_images(img1, img2, self.mean, self.std)
        # flow and valid_flow_mask pass through untouched (no compute needed).
        return (img1, img2, flow, valid_flow_mask)


if __name__ == "__main__":
    key = jax.random.PRNGKey(0)
    k1, k2, k3, k4 = jax.random.split(key, 4)

    N, C, H, W = 2, 3, 16, 16
    img1 = jax.random.uniform(k1, (N, C, H, W), jnp.float32)
    img2 = jax.random.uniform(k2, (N, C, H, W), jnp.float32)
    flow = jax.random.normal(k3, (N, 2, H, W), jnp.float32)
    valid_flow_mask = (jax.random.uniform(k4, (N, H, W)) > 0.5)

    # Deterministic "parameters" from __init__ (standard ImageNet-style stats).
    mean = [0.485, 0.456, 0.406]
    std = [0.229, 0.224, 0.225]

    transform = Normalize(mean, std)
    out1, out2, out_flow, out_valid = transform(img1, img2, flow, valid_flow_mask)
    jax.block_until_ready((out1, out2, out_flow, out_valid))

    # Reference check in plain JAX (true division, as PyTorch does).
    m = jnp.asarray(mean, jnp.float32)[None, :, None, None]
    s = jnp.asarray(std, jnp.float32)[None, :, None, None]
    ref1 = (img1 - m) / s
    ref2 = (img2 - m) / s
    assert jnp.allclose(out1, ref1, atol=1e-5, rtol=1e-5)
    assert jnp.allclose(out2, ref2, atol=1e-5, rtol=1e-5)
    assert jnp.array_equal(out_flow, flow)
    assert jnp.array_equal(out_valid, valid_flow_mask)

    print("KERNEL_OK")
</pallas_src>

<mosaic_0001>
module attributes {stable_mosaic.version = 11 : i64} {
  func.func @_normalize_kernel(%arg0: i32, %arg1: memref<6x1xf32, #tpu.memory_space<vmem>>, %arg2: memref<6x1xf32, #tpu.memory_space<vmem>>, %arg3: memref<6x256xf32, #tpu.memory_space<vmem>>, %arg4: memref<6x256xf32, #tpu.memory_space<vmem>>, %arg5: memref<6x256xf32, #tpu.memory_space<vmem>>, %arg6: memref<6x256xf32, #tpu.memory_space<vmem>>) attributes {dimension_semantics = [#tpu.dimension_semantics<parallel>], iteration_bounds = array<i64: 1>, scalar_prefetch = 0 : i64, scratch_operands = 0 : i64, tpu.core_type = #tpu.core_type<tc>, window_params = [{pipeline_mode = #tpu.pipeline_mode<synchronous>, transform_indices = @transform_0, window_bounds = array<i64: 6, 1>}, {pipeline_mode = #tpu.pipeline_mode<synchronous>, transform_indices = @transform_1, window_bounds = array<i64: 6, 1>}, {transform_indices = @transform_2, window_bounds = array<i64: 6, 256>}, {transform_indices = @transform_3, window_bounds = array<i64: 6, 256>}, {transform_indices = @transform_4, window_bounds = array<i64: 6, 256>}, {transform_indices = @transform_5, window_bounds = array<i64: 6, 256>}]} {
    %c0 = arith.constant 0 : index
    %c0_0 = arith.constant 0 : index
    %0 = vector.load %arg1[%c0, %c0_0] : memref<6x1xf32, #tpu.memory_space<vmem>>, vector<6x1xf32>
    %c0_1 = arith.constant 0 : index
    %c0_2 = arith.constant 0 : index
    %1 = vector.load %arg2[%c0_1, %c0_2] : memref<6x1xf32, #tpu.memory_space<vmem>>, vector<6x1xf32>
    %cst = arith.constant 1.000000e+00 : f32
    %2 = vector.broadcast %cst : f32 to vector<6x1xf32>
    %3 = arith.divf %2, %1 : vector<6x1xf32>
    %c0_3 = arith.constant 0 : index
    %c0_4 = arith.constant 0 : index
    %4 = vector.load %arg3[%c0_3, %c0_4] : memref<6x256xf32, #tpu.memory_space<vmem>>, vector<6x256xf32>
    %5 = vector.broadcast %0 : vector<6x1xf32> to vector<6x256xf32>
    %6 = arith.subf %4, %5 : vector<6x256xf32>
    %7 = vector.broadcast %3 : vector<6x1xf32> to vector<6x256xf32>
    %8 = arith.mulf %6, %7 : vector<6x256xf32>
    %c0_5 = arith.constant 0 : index
    %c0_6 = arith.constant 0 : index
    %9 = vector.load %arg5[%c0_5, %c0_6] : memref<6x256xf32, #tpu.memory_space<vmem>>, vector<6x256xf32>
    tpu.vector_store %arg5[%c0_5, %c0_6], %8 {strides = array<i32>} : memref<6x256xf32, #tpu.memory_space<vmem>>, vector<6x256xf32>,
    %c0_7 = arith.constant 0 : index
    %c0_8 = arith.constant 0 : index
    %10 = vector.load %arg4[%c0_7, %c0_8] : memref<6x256xf32, #tpu.memory_space<vmem>>, vector<6x256xf32>
    %11 = vector.broadcast %0 : vector<6x1xf32> to vector<6x256xf32>
    %12 = arith.subf %10, %11 : vector<6x256xf32>
    %13 = vector.broadcast %3 : vector<6x1xf32> to vector<6x256xf32>
    %14 = arith.mulf %12, %13 : vector<6x256xf32>
    %c0_9 = arith.constant 0 : index
    %c0_10 = arith.constant 0 : index
    %15 = vector.load %arg6[%c0_9, %c0_10] : memref<6x256xf32, #tpu.memory_space<vmem>>, vector<6x256xf32>
    tpu.vector_store %arg6[%c0_9, %c0_10], %14 {strides = array<i32>} : memref<6x256xf32, #tpu.memory_space<vmem>>, vector<6x256xf32>,
    return
  }
  func.func @transform_0(%arg0: i32) -> (i32, i32) {
    %c0_i32 = arith.constant 0 : i32
    %c0_i32_0 = arith.constant 0 : i32
    %c0_i32_1 = arith.constant 0 : i32
    return %c0_i32, %c0_i32_0 : i32, i32
  }
  func.func @transform_1(%arg0: i32) -> (i32, i32) {
    %c0_i32 = arith.constant 0 : i32
    %c0_i32_0 = arith.constant 0 : i32
    %c0_i32_1 = arith.constant 0 : i32
    return %c0_i32, %c0_i32_0 : i32, i32
  }
  func.func @transform_2(%arg0: i32) -> (i32, i32) {
    %c0_i32 = arith.constant 0 : i32
    %c0_i32_0 = arith.constant 0 : i32
    return %c0_i32, %arg0 : i32, i32
  }
  func.func @transform_3(%arg0: i32) -> (i32, i32) {
    %c0_i32 = arith.constant 0 : i32
    %c0_i32_0 = arith.constant 0 : i32
    return %c0_i32, %arg0 : i32, i32
  }
  func.func @transform_4(%arg0: i32) -> (i32, i32) {
    %c0_i32 = arith.constant 0 : i32
    %c0_i32_0 = arith.constant 0 : i32
    return %c0_i32, %arg0 : i32, i32
  }
  func.func @transform_5(%arg0: i32) -> (i32, i32) {
    %c0_i32 = arith.constant 0 : i32
    %c0_i32_0 = arith.constant 0 : i32
    return %c0_i32, %arg0 : i32, i32
  }
}

</mosaic_0001>

<bundles_post_ra>
// kernel: tpu_custom_call.1
= control target key start
LH: loop header
LB: loop body
LE: loop exit
PB: predicated region body
PF: predicated region fallthrough
CT: control target
= control target key end

     0   :  { %11 = vsyncpa [#allocation3], 0  ;;  %s260_s0 = inlined_call_operand.vmem [shape: f32[6,1], index: 0, kind: input, shape index: {}]   ;;  %s261_s1 = inlined_call_operand.vmem [shape: f32[6,1], index: 1, kind: input, shape index: {}]   ;;  %s262_s2 = inlined_call_operand.vmem [shape: f32[6,256], index: 2, kind: input, shape index: {}]   ;;  %s263_s3 = inlined_call_operand.hbm [shape: f32[6,256], index: 3, kind: input, shape index: {}]   ;;  %s264_s4 = inlined_call_operand.hbm [shape: f32[6,256], index: 4, kind: output, shape index: {0}]   ;;  %s265_s5 = inlined_call_operand.hbm [shape: f32[6,256], index: 5, kind: output, shape index: {1}]  }
   0x1   :  { %12 = vsyncpa [#allocation4], 0 }
   0x2   :  { %13 = vsyncpa [#allocation7], 0  ;;  %s171_s18 = smov [#allocation2]   ;;  %s99_s22 = scalar_lea.hbm %s263_s3, 256 }
   0x3   :  { %s26_s19 = sshll.u32 %s171_s18, 4  ;;  %p100_p0 = scmp.ne.s32.totalorder %s263_s3, %s99_s22  ;;  %s27_s19 = int_to_ptr.vmem [resolvable:$true] %s26_s19 }
   0x4   :  { %p103_p1 = scmp.lt.u32.totalorder %s99_s22, %s263_s3 }
   0x6   :  { %p105_p2 = pnand %p103_p1, %p100_p0 }
   0x8   :  { %108 = shalt.err (!%p105_p2)
}
   0x9   :  { %s109_s27 = scalar_lea.vmem %s27_s19, 256  ;;  %p114_p4 = scmp.lt.s32.totalorder %s27_s19, %s27_s19 }
   0xa   :  { %p110_p3 = scmp.ne.s32.totalorder %s27_s19, %s109_s27  ;;  %p115_p5 = scmp.lt.s32.totalorder %s109_s27, %s109_s27 }
   0xc   :  { %p116_p6 = por %p115_p5, %p114_p4 }
   0xe   :  { %p117_p7 = pnand %p116_p6, %p110_p3 }
  0x10   :  { %120 = shalt.err (!%p117_p7)
}
  0x11   :  { %29 = dma.hbm_to_vmem [thread:$0]  %s263_s3, 256, %s27_s19, [#allocation3]  }
  0x12   :  { %165 = dma.done.wait [#allocation3], 256  }
  0x13   :  { %166 = vsyncadd [#allocation3], 4294967040  ;;  %v172_v0 = vmov 0   ;;  %v33_v1 = vld [vmem:[%s260_s0] sm:$0x3f]  ;;  %s173_s0 = smov [#allocation5]  }
  0x14   :  { %96 = vset.pattern.permute.xlu0 %v172_v0  ;;  %v34_v2 = vld [vmem:[%s261_s1] sm:$0x3f]  ;;  %v38_v6 = vld [vmem:[%s262_s2 + $0x8] sm:$0x3f]  ;;  %v55_v7 = vld [vmem:[#allocation2] sm:$0x3f] }
  0x15   :  { %41 = vperm.xlu0 %96, %v33_v1   ;;  %97 = vrcp.f32 %v34_v2  ;;  %v37_v5 = vld [vmem:[%s262_s2] sm:$0x3f]  ;;  %s69_s12 = sshll.u32 %s173_s0, 4  ;;  %s174_s1 = smov [#allocation6]   ;;  %s70_s12 = int_to_ptr.vmem [resolvable:$true] %s69_s12 }
  0x16   :  { %v56_v8 = vld [vmem:[#allocation2 + $0x8] sm:$0x3f]  ;;  %s79_s13 = sshll.u32 %s174_s1, 4  ;;  %s121_s2 = scalar_lea.vmem %s70_s12, 256  ;;  %s229_s13 = int_to_ptr.vmem [resolvable:$true] %s79_s13 }
  0x17   :  { %p122_p8 = scmp.ne.s32.totalorder %s70_s12, %s121_s2  ;;  %p126_p9 = scmp.lt.s32.totalorder %s70_s12, %s70_s12 }
  0x18   :  { %p127_p10 = scmp.lt.s32.totalorder %s121_s2, %s121_s2 }
  0x1a   :  { %p128_p11 = por %p127_p10, %p126_p9 }
  0x1c   :  { %p129_p12 = pnand %p128_p11, %p122_p8 }
  0x1f   :  { %v98_v3 = vpop.eup %97 }
  0x20   :  { %48 = vperm.xlu0 %96, %v98_v3  }
  0x94   :  { %v42_v4 = vpop.permute.xlu0 %41 }
  0x95   :  { %v44_v9 = vsub.f32 %v37_v5, %v42_v4  ;;  %v45_v10 = vsub.f32 %v38_v6, %v42_v4  ;;  %v57_v11 = vsub.f32 %v55_v7, %v42_v4  ;;  %v58_v12 = vsub.f32 %v56_v8, %v42_v4 }
  0x9f   :  { %v49_v13 = vpop.permute.xlu0 %48 }
  0xa0   :  { %v51_v14 = vmul.f32 %v49_v13, %v44_v9  ;;  %v52_v15 = vmul.f32 %v49_v13, %v45_v10  ;;  %v59_v16 = vmul.f32 %v57_v11, %v49_v13  ;;  %v60_v17 = vmul.f32 %v58_v12, %v49_v13 }
  0xa2   :  { %53 = vst [vmem:[#allocation5] sm:$0x3f] %v51_v14  ;;  %54 = vst [vmem:[#allocation5 + $0x8] sm:$0x3f] %v52_v15 }
  0xa3   :  { %61 = vst [vmem:[#allocation6] sm:$0x3f] %v59_v16  ;;  %62 = vst [vmem:[#allocation6 + $0x8] sm:$0x3f] %v60_v17 }
  0xa4   :  { %132 = shalt.err (!%p129_p12)
}
  0xa5   :  { %s133_s16 = scalar_lea.hbm %s264_s4, 256 }
  0xa6   :  { %p134_p13 = scmp.ne.s32.totalorder %s264_s4, %s133_s16  ;;  %p137_p0 = scmp.lt.u32.totalorder %s133_s16, %s264_s4 }
  0xa8   :  { %p139_p1 = pnand %p137_p0, %p134_p13 }
  0xaa   :  { %142 = shalt.err (!%p139_p1)
}
  0xab   :  { %72 = dma.vmem_to_hbm [thread:$0]  %s70_s12, 256, %s264_s4, [#allocation4]  }
  0xac   :  { %s143_s23 = scalar_lea.vmem %s229_s13, 256  ;;  %p148_p3 = scmp.lt.s32.totalorder %s229_s13, %s229_s13 }
  0xad   :  { %p144_p2 = scmp.ne.s32.totalorder %s229_s13, %s143_s23  ;;  %p149_p4 = scmp.lt.s32.totalorder %s143_s23, %s143_s23 }
  0xaf   :  { %p150_p5 = por %p149_p4, %p148_p3 }
  0xb1   :  { %p151_p6 = pnand %p150_p5, %p144_p2 }
  0xb3   :  { %154 = shalt.err (!%p151_p6)
}
  0xb4   :  { %s155_s26 = scalar_lea.hbm %s265_s5, 256 }
  0xb5   :  { %p156_p7 = scmp.ne.s32.totalorder %s265_s5, %s155_s26  ;;  %p159_p8 = scmp.lt.u32.totalorder %s155_s26, %s265_s5 }
  0xb7   :  { %p161_p9 = pnand %p159_p8, %p156_p7 }
  0xb9   :  { %164 = shalt.err (!%p161_p9)
}
  0xba   :  { %82 = dma.vmem_to_hbm [thread:$0]  %s229_s13, 256, %s265_s5, [#allocation7]  }
  0xbb   :  { %167 = dma.done.wait [#allocation4], 256  }
  0xbc   :  { %168 = vsyncadd [#allocation4], 4294967040 }
  0xbd   :  { %169 = dma.done.wait [#allocation7], 256  }
  0xbe   :  { %170 = vsyncadd [#allocation7], 4294967040 }
  0xbf   :  { %89 = vsyncpa [#allocation3], 1 }
  0xc0   :  { %90 = vsyncpa [#allocation4], 1 }
  0xc1   :  { %91 = vsyncpa [#allocation7], 1 }

</bundles_post_ra>
